<compile_context>
chip_gen: v7x
topology: tpu7x:2x2x1
jax: 0.10.0
libtpu: 0.0.40
codegen_flags: <defaults>
</compile_context>

<pallas_src>
import functools

import jax
import jax.numpy as jnp
from jax import lax
from jax.experimental import pallas as pl
from jax.experimental.pallas import tpu as pltpu


def _round_up(x, m):
    return ((x + m - 1) // m) * m


def make_cross_entropy_loss(num_classes, epsilon=0.1, label_smooth=True, tile_b=None):
    eps = float(epsilon) if label_smooth else 0.0

    def ce_tile_kernel(logits_ref, tgt_ref, out_ref, *, actual_b, tile_rows):
        # logits_ref: (TILE_B, K) in VMEM; tgt_ref: (TILE_B, 1) int32 in VMEM
        # out_ref:    (TILE_B, 1) float32 in VMEM (per-row loss contributions)
        x = logits_ref[...].astype(jnp.float32)               # (TILE_B, K)
        t = tgt_ref[...]                                      # (TILE_B, 1) int32
        tb, k = x.shape

        # row-wise stable logsumexp pieces
        m = jnp.max(x, axis=-1, keepdims=True)                # (TILE_B, 1)
        lse = jnp.log(jnp.sum(jnp.exp(x - m), axis=-1, keepdims=True))
        mlse = m + lse                                        # (TILE_B, 1)

        # logit at the target class: one select + lane reduce (no one_hot matrix)
        col = lax.broadcasted_iota(jnp.int32, (tb, k), 1)
        x_t = jnp.sum(jnp.where(col == t, x, 0.0), axis=-1, keepdims=True)

        # loss_i = -(1-eps)*logp_target - (eps/K)*sum_j logp_j
        per_row = -(1.0 - eps) * (x_t - mlse)
        if eps != 0.0:
            sum_x = jnp.sum(x, axis=-1, keepdims=True)
            sum_logp = sum_x - float(k) * mlse
            per_row = per_row - (eps / float(k)) * sum_logp

        # mask zero-padded remainder rows (static decision at trace time)
        if actual_b % tile_rows != 0:
            i = pl.program_id(0)
            row = i * tile_rows + lax.broadcasted_iota(jnp.int32, (tb, 1), 0)
            per_row = jnp.where(row < actual_b, per_row, 0.0)

        out_ref[...] = per_row

    def loss_fn(inputs, targets):
        B, K = inputs.shape
        assert K == num_classes, (K, num_classes)
        itemsize = jnp.dtype(inputs.dtype).itemsize

        # Pick TILE_B: largest multiple of 8 (<= 512) whose 2x double-buffered input
        # blocks fit in ~16 MiB — keeps pipelining alive on v7x (64 MiB VMEM) too.
        if tile_b is None:
            budget = 16 * 1024 * 1024
            max_rows = max(8, budget // (2 * K * itemsize))
            tb = min(512, max_rows, _round_up(B, 8))
            tb = max(8, (tb // 8) * 8)
        else:
            tb = max(8, _round_up(int(tile_b), 8))

        num_tiles = (B + tb - 1) // tb
        b_pad = num_tiles * tb

        tgt2d = targets.astype(jnp.int32).reshape(B, 1)
        x = inputs
        if b_pad != B:
            x = jnp.pad(x, ((0, b_pad - B), (0, 0)))
            tgt2d = jnp.pad(tgt2d, ((0, b_pad - B), (0, 0)))

        vmem_limit = int(min(100 * 1024 * 1024,
                             max(16 * 1024 * 1024, 6 * tb * K * itemsize)))

        kernel = functools.partial(ce_tile_kernel, actual_b=B, tile_rows=tb)
        per_row_losses = pl.pallas_call(
            kernel,
            out_shape=jax.ShapeDtypeStruct((b_pad, 1), jnp.float32),
            grid=(num_tiles,),
            in_specs=[
                pl.BlockSpec((tb, K), lambda i: (i, 0)),   # logits tile (VMEM)
                pl.BlockSpec((tb, 1), lambda i: (i, 0)),   # targets tile (VMEM)
            ],
            out_specs=pl.BlockSpec((tb, 1), lambda i: (i, 0)),
            compiler_params=pltpu.CompilerParams(
                dimension_semantics=("parallel",),
                vmem_limit_bytes=vmem_limit,
            ),
        )(x, tgt2d)

        # Finalize outside the kernel: tiny sum + single division by (real) B.
        return jnp.sum(per_row_losses) / B

    return loss_fn


if __name__ == "__main__":
    # Small shapes consistent with the module: (batch, num_classes) logits + int targets.
    # B=12 with tile_b=8 exercises the multi-tile grid AND the remainder row-masking path;
    # K=128 keeps the class axis lane-dense.
    B, K = 12, 128
    key = jax.random.PRNGKey(0)
    k_logits, k_tgt = jax.random.split(key)
    logits = jax.random.normal(k_logits, (B, K), dtype=jnp.float32)
    targets = jax.random.randint(k_tgt, (B,), 0, K, dtype=jnp.int32)

    ce_loss = make_cross_entropy_loss(num_classes=K, epsilon=0.1,
                                      label_smooth=True, tile_b=8)
    loss = jax.block_until_ready(ce_loss(logits, targets))

    # pure-JAX reference check (matches the PyTorch module's math)
    eps = 0.1
    log_probs = jax.nn.log_softmax(logits, axis=1)
    one_hot = jax.nn.one_hot(targets, K, dtype=jnp.float32)
    smoothed = (1.0 - eps) * one_hot + eps / K
    ref = jnp.sum(jnp.mean(-smoothed * log_probs, axis=0))
    assert jnp.allclose(loss, ref, atol=1e-5, rtol=1e-5), (loss, ref)

    print("KERNEL_OK")
</pallas_src>

<mosaic_0001>
module attributes {stable_mosaic.version = 11 : i64} {
  func.func @ce_tile_kernel(%arg0: i32, %arg1: memref<8x128xf32, #tpu.memory_space<vmem>>, %arg2: memref<8x1xi32, #tpu.memory_space<vmem>>, %arg3: memref<8x1xf32, #tpu.memory_space<vmem>>) attributes {dimension_semantics = [#tpu.dimension_semantics<parallel>], iteration_bounds = array<i64: 2>, scalar_prefetch = 0 : i64, scratch_operands = 0 : i64, tpu.core_type = #tpu.core_type<tc>, window_params = [{transform_indices = @transform_0, window_bounds = array<i64: 8, 128>}, {transform_indices = @transform_1, window_bounds = array<i64: 8, 1>}, {transform_indices = @transform_2, window_bounds = array<i64: 8, 1>}]} {
    %c0 = arith.constant 0 : index
    %c0_0 = arith.constant 0 : index
    %0 = vector.load %arg1[%c0, %c0_0] : memref<8x128xf32, #tpu.memory_space<vmem>>, vector<8x128xf32>
    %c0_1 = arith.constant 0 : index
    %c0_2 = arith.constant 0 : index
    %1 = vector.load %arg2[%c0_1, %c0_2] : memref<8x1xi32, #tpu.memory_space<vmem>>, vector<8x1xi32>
    %cst = arith.constant dense<0xFF800000> : vector<8xf32>
    %2 = vector.multi_reduction <maximumf>, %0, %cst [1] : vector<8x128xf32> to vector<8xf32>
    %3 = vector.shape_cast %2 : vector<8xf32> to vector<8x1xf32>
    %4 = vector.broadcast %3 : vector<8x1xf32> to vector<8x128xf32>
    %5 = arith.subf %0, %4 : vector<8x128xf32>
    %6 = math.exp %5 : vector<8x128xf32>
    %cst_3 = arith.constant dense<0.000000e+00> : vector<8xf32>
    %7 = vector.multi_reduction <add>, %6, %cst_3 [1] : vector<8x128xf32> to vector<8xf32>
    %8 = vector.shape_cast %7 : vector<8xf32> to vector<8x1xf32>
    %9 = math.log %8 : vector<8x1xf32>
    %10 = arith.addf %3, %9 : vector<8x1xf32>
    %11 = tpu.iota {dimensions = array<i32: 1>} : vector<8x128xi32>
    %12 = vector.broadcast %1 : vector<8x1xi32> to vector<8x128xi32>
    %13 = arith.cmpi eq, %11, %12 : vector<8x128xi32>
    %cst_4 = arith.constant 0.000000e+00 : f32
    %14 = vector.broadcast %cst_4 : f32 to vector<8x128xf32>
    %15 = arith.select %13, %0, %14 : vector<8x128xi1>, vector<8x128xf32>
    %cst_5 = arith.constant dense<0.000000e+00> : vector<8xf32>
    %16 = vector.multi_reduction <add>, %15, %cst_5 [1] : vector<8x128xf32> to vector<8xf32>
    %17 = vector.shape_cast %16 : vector<8xf32> to vector<8x1xf32>
    %18 = arith.subf %17, %10 : vector<8x1xf32>
    %cst_6 = arith.constant -0.899999976 : f32
    %19 = vector.broadcast %cst_6 : f32 to vector<8x1xf32>
    %20 = arith.mulf %19, %18 : vector<8x1xf32>
    %cst_7 = arith.constant dense<0.000000e+00> : vector<8xf32>
    %21 = vector.multi_reduction <add>, %0, %cst_7 [1] : vector<8x128xf32> to vector<8xf32>
    %22 = vector.shape_cast %21 : vector<8xf32> to vector<8x1xf32>
    %cst_8 = arith.constant 1.280000e+02 : f32
    %23 = vector.broadcast %cst_8 : f32 to vector<8x1xf32>
    %24 = arith.mulf %23, %10 : vector<8x1xf32>
    %25 = arith.subf %22, %24 : vector<8x1xf32>
    %cst_9 = arith.constant 7.812500e-04 : f32
    %26 = vector.broadcast %cst_9 : f32 to vector<8x1xf32>
    %27 = arith.mulf %26, %25 : vector<8x1xf32>
    %28 = arith.subf %20, %27 : vector<8x1xf32>
    %c8_i32 = arith.constant 8 : i32
    %29 = arith.muli %arg0, %c8_i32 : i32
    %30 = tpu.iota {dimensions = array<i32: 0>} : vector<8x1xi32>
    %31 = vector.broadcast %29 : i32 to vector<8x1xi32>
    %32 = arith.addi %31, %30 : vector<8x1xi32>
    %c12_i32 = arith.constant 12 : i32
    %33 = vector.broadcast %c12_i32 : i32 to vector<8x1xi32>
    %34 = arith.cmpi slt, %32, %33 : vector<8x1xi32>
    %cst_10 = arith.constant 0.000000e+00 : f32
    %35 = vector.broadcast %cst_10 : f32 to vector<8x1xf32>
    %36 = arith.select %34, %28, %35 : vector<8x1xi1>, vector<8x1xf32>
    %c0_11 = arith.constant 0 : index
    %c0_12 = arith.constant 0 : index
    %37 = vector.load %arg3[%c0_11, %c0_12] : memref<8x1xf32, #tpu.memory_space<vmem>>, vector<8x1xf32>
    tpu.vector_store %arg3[%c0_11, %c0_12], %36 {strides = array<i32>} : memref<8x1xf32, #tpu.memory_space<vmem>>, vector<8x1xf32>,
    return
  }
  func.func @transform_0(%arg0: i32) -> (i32, i32) {
    %c0_i32 = arith.constant 0 : i32
    %c0_i32_0 = arith.constant 0 : i32
    return %arg0, %c0_i32 : i32, i32
  }
  func.func @transform_1(%arg0: i32) -> (i32, i32) {
    %c0_i32 = arith.constant 0 : i32
    %c0_i32_0 = arith.constant 0 : i32
    return %arg0, %c0_i32 : i32, i32
  }
  func.func @transform_2(%arg0: i32) -> (i32, i32) {
    %c0_i32 = arith.constant 0 : i32
    %c0_i32_0 = arith.constant 0 : i32
    return %arg0, %c0_i32 : i32, i32
  }
}

</mosaic_0001>

<bundles_post_ra>
// kernel: tpu_custom_call.1
= control target key start
LH: loop header
LB: loop body
LE: loop exit
PB: predicated region body
PF: predicated region fallthrough
CT: control target
= control target key end

     0   :  { %s308_s9 = smov 0   ;;  %s338_s0 = inlined_call_operand.vmem [shape: f32[16,128], index: 0, kind: input, shape index: {}]   ;;  %s339_s1 = inlined_call_operand.vmem [shape: s32[16,1], index: 1, kind: input, shape index: {}]   ;;  %s340_s2 = inlined_call_operand.vmem [shape: f32[16,1], index: 2, kind: output, shape index: {}]  }
   0x1 LB: > { %s314_s10 = sadd.s32 4294967295, %s290_s9   ;;  %p263_p0 = scmp.ge.s32.totalorder %s290_s9, 1  ;;  %s290_s9 = sphi %s308_s9, %s12_s9  }
   0x2   : > { %p120_p1 = scmp.lt.s32.totalorder %s290_s9, 3 }
   0x4   : > { %p121_p2 = pnand %p263_p0, %p120_p1 }
   0x5   : > { %p144_p3 = scmp.lt.s32.totalorder (!%p121_p2), %s314_s10, 1  ;;  %v292_v0 = vmov (!%p121_p2), 0   ;;  %v168_v6 = vlaneseq (!%p121_p2)  ;;  %s267_s19 = sshll.u32 (!%p121_p2), %s314_s10, 3  ;;  %vm192_vm2 = vcmask (!%p121_p2), 7168  }
   0x6   : > { %124 = sbr.rel (%p121_p2) target bundleno = 342 (0x156), region = 28  ;;  %279 = vset.pattern.permute.xlu0 (!%p121_p2), %v292_v0  ;;  %v188_v17 = vstv (!%p121_p2), %s267_s19 }
   0x7   : > { %v169_v7 = vand.u32 (!%p121_p2), 127, %v168_v6  ;;  %v187_v15 = vshrl.u32 (!%p121_p2), %v168_v6, 7 }
   0x9   : > { %v189_v21 = vadd.s32 (!%p121_p2), %v188_v17, %v187_v15 }
   0xb   : > { %vm190_vm1 = vcmp.lt.s32.totalorder (!%p121_p2), %v189_v21, 12 }
   0xd   : > { %s145_s11 = scalar_select %p144_p3, %s314_s10, 1 }
   0xf   : > { %s320_s12 = sshll.u32 %s145_s11, 3 }
  0x10   : > { %s147_s15 = scalar_lea.vmem %s338_s0, %s320_s12  ;;  %s151_s18 = scalar_lea.vmem %s339_s1, %s320_s12 }
  0x11   : > { %v156_v1 = vld [vmem:[%s147_s15] sm:$0xff]  ;;  %s155_s22 = scalar_lea.vmem %s340_s2, %s320_s12 }
  0x12   : > { %158 = vmax.xlane.f32.xlu0 %v156_v1  ;;  %v157_v2 = vld [vmem:[%s151_s18] sm:$0xff] }
  0x28   : > { %171 = vperm.xlu0 %279, %v157_v2  }
  0x9f   : > { %v159_v3 = vpop.xlane.xlu0 %158 }
  0xa0   : > { %v160_v4 = vsub.f32 %v156_v1, %v159_v3 }
  0xa2   : > { %v161_v5 = vmul.f32 1.442695, %v160_v4 }
  0xa4   : > { %280 = vpow2.f32 %v161_v5 }
  0xa7   : > { %v172_v8 = vpop.permute.xlu0 %171 }
  0xa8   : > { %vm173_vm0 = vcmp.eq.s32.totalorder %v169_v7, %v172_v8 }
  0xa9   : > { %v174_v10 = vsel %vm173_vm0, %v156_v1, 0.0 }
  0xae   : > { %v281_v9 = vpop.eup %280 }
  0xaf   : > { %163 = vadd.xlane.f32.xlu1 %v281_v9 }
  0xb3   : > { %175 = vadd.xlane.f32.xlu1 %v174_v10 }
  0xb7   : > { %179 = vadd.xlane.f32.xlu1 %v156_v1 }
 0x13c   : > { %v164_v11 = vpop.xlane.xlu1 %163 }
 0x13d   : > { %282 = vlog2.f32 %v164_v11 }
 0x140   : > { %v176_v12 = vpop.xlane.xlu1 %175 }
 0x144   : > { %v180_v18 = vpop.xlane.xlu1 %179 }
 0x147   : > { %v283_v13 = vpop.eup %282 }
 0x148   : > { %v166_v14 = vmul.f32 0.6931472, %v283_v13 }
 0x14a   : > { %v167_v16 = vadd.f32 %v166_v14, %v159_v3 }
 0x14c   : > { %v177_v19 = vsub.f32 %v176_v12, %v167_v16  ;;  %v181_v20 = vmul.f32 128.0, %v167_v16 }
 0x14e   : > { %v182_v22 = vsub.f32 %v180_v18, %v181_v20  ;;  %v178_v23 = vmul.f32 -0.9, %v177_v19 }
 0x150   : > { %v183_v24 = vmul.f32 0.00078125, %v182_v22 }
 0x152   : > { %v184_v25 = vsub.f32 %v178_v23, %v183_v24 }
 0x154   : > { %v191_v26 = vsel %vm190_vm1, %v184_v25, 0.0 }
 0x155   : > { %193 = vst.msk [vmem:[%s155_s22] sm:$0xff] %vm192_vm2, %v191_v26 }
 0x156 PF: > { %s12_s9 = sadd.s32 1, %s290_s9  }
 0x157   : > { %p9_p4 = scmp.ge.s32.totalorder %s12_s9, 4  }
 0x159   :  { %11 = sbr.rel (!%p9_p4) target bundleno = 1 (0x1), region = 61 }

</bundles_post_ra>
